<compile_context>
chip_gen: v6e
topology: v6e:2x2x1
jax: 0.10.0
libtpu: 0.0.40
codegen_flags: <defaults>
</compile_context>

<pallas_src>
import jax
import jax.numpy as jnp
from jax.experimental import pallas as pl
from jax.experimental.pallas import tpu as pltpu


def _round_up(x: int, m: int) -> int:
    return (x + m - 1) // m * m


def _divisor_tile(dim: int, granule: int, target: int) -> int:
    """Largest multiple of `granule` that divides `dim` and is <= max(target, granule)."""
    n = dim // granule
    cap = max(target // granule, 1)
    best = 1
    d = 1
    while d * d <= n:
        if n % d == 0:
            for c in (d, n // d):
                if c <= cap and c > best:
                    best = c
        d += 1
    return best * granule


def _pick_vmem_limit() -> int:
    """Scoped-VMEM limit: 3/4 of physical, capped at 96 MiB.

    => ~48 MiB on v7x (64 MiB/TC), 96 MiB on v5e/v6e (128 MiB/TC).
    """
    cap = 64 * 1024 * 1024
    try:
        info = pltpu.get_tpu_info()
        cap = getattr(info, "vmem_capacity_bytes", cap) or cap
    except Exception:
        pass
    return int(min(cap * 3 // 4, 96 * 1024 * 1024))


_VMEM_LIMIT = _pick_vmem_limit()


# --------------------------------------------------------------------------
# Kernels
# --------------------------------------------------------------------------
def _linear_kernel_f32_out(x_ref, w_ref, b_ref, o_ref):
    """f32 output: accumulate directly into the VMEM-resident output block.

    The output BlockSpec returns the same (i, j) block for every K step, so
    o_ref stays resident across the reduction axis — no scratch needed.
    """
    k = pl.program_id(2)
    p = jnp.dot(x_ref[...], w_ref[...], preferred_element_type=jnp.float32)

    @pl.when(k == 0)
    def _first():
        # First partial product + bias (added exactly once), no zero-init pass.
        o_ref[...] = p + b_ref[...].astype(jnp.float32)

    @pl.when(k > 0)
    def _rest():
        o_ref[...] += p


def _linear_kernel_acc(x_ref, w_ref, b_ref, o_ref, acc_ref):
    """Non-f32 output: f32 scratch accumulator, cast once at the last K step."""
    k = pl.program_id(2)
    p = jnp.dot(x_ref[...], w_ref[...], preferred_element_type=jnp.float32)

    @pl.when(k == 0)
    def _first():
        acc_ref[...] = p + b_ref[...].astype(jnp.float32)

    @pl.when(k > 0)
    def _rest():
        acc_ref[...] += p

    @pl.when(k == pl.num_programs(2) - 1)
    def _finalize():
        o_ref[...] = acc_ref[...].astype(o_ref.dtype)


# --------------------------------------------------------------------------
# Pallas launch wrapper
# --------------------------------------------------------------------------
def _pallas_linear(x, wp, bp, d_out, *, use_bf16, tm, tn, tk):
    """y = x @ wp + bp, with wp/bp already padded to 128-lane granularity."""
    B, D_in = x.shape
    Kp, Np = wp.shape
    out_dtype = x.dtype

    # Pad x only to sublane/lane granularity (K pad matches the pre-padded weight).
    Mp = _round_up(B, 8)
    if Mp != B or Kp != D_in:
        x = jnp.pad(x, ((0, Mp - B), (0, Kp - D_in)))
    if use_bf16:
        x = x.astype(jnp.bfloat16)

    # Tiles = largest granule-aligned divisors of the padded dims (no extra padding).
    tm = _divisor_tile(Mp, 8, tm)
    tk = _divisor_tile(Kp, 128, tk)
    tn = _divisor_tile(Np, 128, tn)
    # v7x has 2 TensorCores: guarantee >= 2 parallel (M, N) tiles when possible.
    if (Mp // tm) * (Np // tn) < 2 and Np >= 256:
        tn = _divisor_tile(Np, 128, Np // 2)

    grid = (Mp // tm, Np // tn, Kp // tk)

    if out_dtype == jnp.float32:
        kernel = _linear_kernel_f32_out
        scratch = []
    else:
        kernel = _linear_kernel_acc
        scratch = [pltpu.VMEM((tm, tn), jnp.float32)]

    out = pl.pallas_call(
        kernel,
        out_shape=jax.ShapeDtypeStruct((Mp, Np), out_dtype),
        grid_spec=pltpu.PrefetchScalarGridSpec(
            num_scalar_prefetch=0,
            grid=grid,
            in_specs=[
                # x tile: indexed by (M, K)
                pl.BlockSpec((tm, tk), lambda i, j, k: (i, k)),
                # w tile: indexed by (K, N)
                pl.BlockSpec((tk, tn), lambda i, j, k: (k, j)),
                # bias tile: indexed only by N (not re-fetched per K step)
                pl.BlockSpec((1, tn), lambda i, j, k: (0, j)),
            ],
            out_specs=pl.BlockSpec((tm, tn), lambda i, j, k: (i, j)),
            scratch_shapes=scratch,
        ),
        compiler_params=pltpu.CompilerParams(
            dimension_semantics=("parallel", "parallel", "arbitrary"),
            vmem_limit_bytes=_VMEM_LIMIT,
        ),
    )(x, wp, bp)

    return out[:B, :d_out]


class FullyConnected:
    """Pallas port of torch.nn.Linear(input_dim, output_dim): y = x @ W^T + b.

    Weight/bias are laid out as (D_in, D_out) and padded to lane granularity
    once at construction time (outside the per-call hot path).
    """

    def __init__(self, w, b, *, use_bf16=False, tm=512, tn=512, tk=1024):
        # w: (D_out, D_in) in PyTorch layout.
        d_out, d_in = w.shape
        self.d_in, self.d_out = d_in, d_out
        self.use_bf16 = use_bf16
        self.tm, self.tn, self.tk = tm, tn, tk

        wt = jnp.asarray(w).T                       # (D_in, D_out)
        self.w_unpadded = wt
        self.b_unpadded = jnp.asarray(b)

        Kp, Np = _round_up(d_in, 128), _round_up(d_out, 128)
        wp = wt
        if Kp != d_in or Np != d_out:
            wp = jnp.pad(wt, ((0, Kp - d_in), (0, Np - d_out)))
        if use_bf16:
            wp = wp.astype(jnp.bfloat16)
        bp = self.b_unpadded.reshape(1, d_out)
        if Np != d_out:
            bp = jnp.pad(bp, ((0, 0), (0, Np - d_out)))
        self.wp, self.bp = wp, bp

    def __call__(self, x, *, force_pallas=False):
        B, d_in = x.shape
        assert d_in == self.d_in, "input feature dim mismatch"
        # Small-shape fast path: a single fused XLA op beats pad->pallas->slice.
        if not force_pallas and B * self.d_in * self.d_out <= 128 * 128 * 128:
            return (x @ self.w_unpadded + self.b_unpadded[None, :]).astype(x.dtype)
        return _pallas_linear(
            x, self.wp, self.bp, self.d_out,
            use_bf16=self.use_bf16, tm=self.tm, tn=self.tn, tk=self.tk,
        )


if __name__ == "__main__":
    key = jax.random.PRNGKey(0)
    k1, k2, k3, k4, k5, k6 = jax.random.split(key, 6)

    # --- Small shape matching the module spirit: Linear(32, 16), batch 8 ------
    batch, d_in, d_out = 8, 32, 16
    bound = 1.0 / (d_in ** 0.5)
    x = jax.random.normal(k1, (batch, d_in), dtype=jnp.float32)
    w = jax.random.uniform(k2, (d_out, d_in), minval=-bound, maxval=bound,
                           dtype=jnp.float32)          # PyTorch (out, in) layout
    b = jax.random.uniform(k3, (d_out,), minval=-bound, maxval=bound,
                           dtype=jnp.float32)

    layer = FullyConnected(w, b)
    ref = x @ w.T + b[None, :]

    y_fast = layer(x)                       # XLA fast path (below work threshold)
    y_pallas = layer(x, force_pallas=True)  # force the Pallas kernel path
    jax.block_until_ready((y_fast, y_pallas))
    assert y_pallas.shape == (batch, d_out)
    assert jnp.allclose(y_fast, ref, atol=1e-5, rtol=1e-5)
    assert jnp.allclose(y_pallas, ref, atol=1e-5, rtol=1e-5)

    # --- Ragged medium shape exercising tiling, padding and megacore split ----
    B2, din2, dout2 = 200, 384, 256
    x2 = jax.random.normal(k4, (B2, din2), dtype=jnp.float32)
    w2 = jax.random.normal(k5, (dout2, din2), dtype=jnp.float32) * 0.02
    b2 = jax.random.normal(k6, (dout2,), dtype=jnp.float32) * 0.1
    ref2 = jnp.dot(x2, w2.T, precision=jax.lax.Precision.HIGHEST) + b2[None, :]

    y2 = FullyConnected(w2, b2)(x2)                      # f32 Pallas path
    jax.block_until_ready(y2)
    assert jnp.allclose(y2, ref2, atol=1e-3, rtol=1e-3)

    y2b = FullyConnected(w2, b2, use_bf16=True)(x2)      # bf16-MXU / f32-acc path
    jax.block_until_ready(y2b)
    assert jnp.allclose(y2b, ref2, atol=5e-2, rtol=5e-2)

    print("KERNEL_OK")
</pallas_src>

<mosaic_0001>
module attributes {stable_mosaic.version = 11 : i64} {
  func.func @_linear_kernel_f32_out(%arg0: i32, %arg1: i32, %arg2: i32, %arg3: memref<8x128xf32, #tpu.memory_space<vmem>>, %arg4: memref<128x128xf32, #tpu.memory_space<vmem>>, %arg5: memref<1x128xf32, #tpu.memory_space<vmem>>, %arg6: memref<8x128xf32, #tpu.memory_space<vmem>>) attributes {dimension_semantics = [#tpu.dimension_semantics<parallel>, #tpu.dimension_semantics<parallel>, #tpu.dimension_semantics<arbitrary>], iteration_bounds = array<i64: 1, 1, 1>, scalar_prefetch = 0 : i64, scratch_operands = 0 : i64, tpu.core_type = #tpu.core_type<tc>, window_params = [{transform_indices = @transform_0, window_bounds = array<i64: 8, 128>}, {transform_indices = @transform_1, window_bounds = array<i64: 128, 128>}, {transform_indices = @transform_2, window_bounds = array<i64: 1, 128>}, {transform_indices = @transform_3, window_bounds = array<i64: 8, 128>}]} {
    %c0 = arith.constant 0 : index
    %c0_0 = arith.constant 0 : index
    %0 = vector.load %arg3[%c0, %c0_0] : memref<8x128xf32, #tpu.memory_space<vmem>>, vector<8x128xf32>
    %c0_1 = arith.constant 0 : index
    %c0_2 = arith.constant 0 : index
    %1 = vector.load %arg4[%c0_1, %c0_2] : memref<128x128xf32, #tpu.memory_space<vmem>>, vector<128x128xf32>
    %cst = arith.constant dense<0.000000e+00> : vector<8x128xf32>
    %2 = tpu.matmul %0, %1, %cst {dimension_numbers = #tpu.dot_dimension_numbers<[1], [0], [0], [1], [0, 0, 1, 1], [], []>} : vector<8x128xf32>, vector<128x128xf32>, vector<8x128xf32> -> vector<8x128xf32>
    %c0_i32 = arith.constant 0 : i32
    %3 = arith.cmpi eq, %arg2, %c0_i32 : i32
    %4 = arith.extui %3 : i1 to i32
    %c0_i32_3 = arith.constant 0 : i32
    %5 = arith.cmpi ne, %4, %c0_i32_3 : i32
    scf.if %5 {
      %c0_6 = arith.constant 0 : index
      %c0_7 = arith.constant 0 : index
      %9 = vector.load %arg5[%c0_6, %c0_7] : memref<1x128xf32, #tpu.memory_space<vmem>>, vector<1x128xf32>
      %10 = vector.broadcast %9 : vector<1x128xf32> to vector<8x128xf32>
      %11 = arith.addf %2, %10 : vector<8x128xf32>
      %c0_8 = arith.constant 0 : index
      %c0_9 = arith.constant 0 : index
      %12 = vector.load %arg6[%c0_8, %c0_9] : memref<8x128xf32, #tpu.memory_space<vmem>>, vector<8x128xf32>
      tpu.vector_store %arg6[%c0_8, %c0_9], %11 {strides = array<i32>} : memref<8x128xf32, #tpu.memory_space<vmem>>, vector<8x128xf32>,
    } else {
    }
    %c0_i32_4 = arith.constant 0 : i32
    %6 = arith.cmpi sgt, %arg2, %c0_i32_4 : i32
    %7 = arith.extui %6 : i1 to i32
    %c0_i32_5 = arith.constant 0 : i32
    %8 = arith.cmpi ne, %7, %c0_i32_5 : i32
    scf.if %8 {
      %c0_6 = arith.constant 0 : index
      %c0_7 = arith.constant 0 : index
      %9 = vector.load %arg6[%c0_6, %c0_7] : memref<8x128xf32, #tpu.memory_space<vmem>>, vector<8x128xf32>
      %10 = arith.addf %9, %2 : vector<8x128xf32>
      %c0_8 = arith.constant 0 : index
      %c0_9 = arith.constant 0 : index
      %11 = vector.load %arg6[%c0_8, %c0_9] : memref<8x128xf32, #tpu.memory_space<vmem>>, vector<8x128xf32>
      tpu.vector_store %arg6[%c0_8, %c0_9], %10 {strides = array<i32>} : memref<8x128xf32, #tpu.memory_space<vmem>>, vector<8x128xf32>,
    } else {
    }
    return
  }
  func.func @transform_0(%arg0: i32, %arg1: i32, %arg2: i32) -> (i32, i32) {
    %c0_i32 = arith.constant 0 : i32
    return %arg0, %arg2 : i32, i32
  }
  func.func @transform_1(%arg0: i32, %arg1: i32, %arg2: i32) -> (i32, i32) {
    %c0_i32 = arith.constant 0 : i32
    return %arg2, %arg1 : i32, i32
  }
  func.func @transform_2(%arg0: i32, %arg1: i32, %arg2: i32) -> (i32, i32) {
    %c0_i32 = arith.constant 0 : i32
    %c0_i32_0 = arith.constant 0 : i32
    return %c0_i32, %arg1 : i32, i32
  }
  func.func @transform_3(%arg0: i32, %arg1: i32, %arg2: i32) -> (i32, i32) {
    %c0_i32 = arith.constant 0 : i32
    return %arg0, %arg1 : i32, i32
  }
}

</mosaic_0001>

<bundles_post_ra>
// kernel: tpu_custom_call.1
= control target key start
LH: loop header
LB: loop body
LE: loop exit
PB: predicated region body
PF: predicated region fallthrough
CT: control target
= control target key end

     0   :  { %8 = vsyncpa [#allocation3], 0  ;;  %s329_s0 = inlined_call_operand.hbm [shape: f32[8,128], index: 0, kind: input, shape index: {}]   ;;  %s330_s1 = inlined_call_operand.hbm [shape: f32[128,128], index: 1, kind: input, shape index: {}]   ;;  %s331_s2 = inlined_call_operand.vmem [shape: f32[1,128], index: 2, kind: input, shape index: {}]   ;;  %s332_s3 = inlined_call_operand.hbm [shape: f32[8,128], index: 3, kind: output, shape index: {}]  }
   0x1   :  { %9 = vsyncpa [#allocation6], 0 }
   0x2   :  { %10 = vsyncpa [#allocation4], 0  ;;  %s290_s12 = smov [#allocation2]   ;;  %s291_s14 = smov [#allocation5]  }
   0x3   :  { %s17_s13 = sshll.u32 %s290_s12, 4  ;;  %s26_s15 = sshll.u32 %s291_s14, 4  ;;  %s18_s13 = int_to_ptr.vmem [resolvable:$true] %s17_s13  ;;  %s27_s15 = int_to_ptr.vmem [resolvable:$true] %s26_s15 }
   0x4   :  { %s232_s16 = scalar_lea.vmem %s18_s13, 128  ;;  %p237_p1 = scmp.lt.s32.totalorder %s18_s13, %s18_s13 }
   0x5   :  { %p233_p0 = scmp.ne.s32.totalorder %s18_s13, %s232_s16  ;;  %p238_p2 = scmp.lt.s32.totalorder %s232_s16, %s232_s16 }
   0x7   :  { %p239_p3 = por %p238_p2, %p237_p1 }
   0x9   :  { %p240_p4 = pnand %p239_p3, %p233_p0 }
   0xb   :  { %243 = shalt.err (!%p240_p4)
}
   0xc   :  { %20 = dma.hbm_to_vmem [thread:$0]  %s329_s0, 128, %s18_s13, [#allocation3]  }
   0xd   :  { %s252_s19 = scalar_lea.vmem %s27_s15, 2048  ;;  %p257_p6 = scmp.lt.s32.totalorder %s27_s15, %s27_s15 }
   0xe   :  { %p253_p5 = scmp.ne.s32.totalorder %s27_s15, %s252_s19  ;;  %p258_p7 = scmp.lt.s32.totalorder %s252_s19, %s252_s19 }
  0x10   :  { %p259_p8 = por %p258_p7, %p257_p6 }
  0x12   :  { %p260_p9 = pnand %p259_p8, %p253_p5 }
  0x14   :  { %263 = shalt.err (!%p260_p9)
}
  0x15   :  { %s292_s20 = smov 128   ;;  %s293_s21 = smov 8  }
  0x16   :  { %32 = dma.hbm_to_vmem [thread:$0]  %s330_s1, 2048, %s27_s15, [#allocation6], %s292_s20, %s292_s20, %s293_s21  }
  0x17   :  { %284 = dma.done.wait [#allocation3], 128  }
  0x18   :  { %285 = vsyncadd [#allocation3], 4294967168 }
  0x19   :  { %286 = dma.done.wait [#allocation6], 2048  }
  0x1a   :  { %287 = vsyncadd [#allocation6], 4294965248  ;;  %v294_v0 = vmov 0.0   ;;  %vm295_vm0 = vmmov 0   ;;  %v57_v1 = vld [vmem:[#allocation5 + $0x78] sm:$0xff]  ;;  %v56_v2 = vld [vmem:[#allocation5 + $0x70] sm:$0xff] }
  0x1b   :  { %182 = vmatprep.subr.mxu0 %v294_v0  ;;  %214 = vmatprep.mubr.msk.f32.mxu0 %vm295_vm0, %v294_v0  ;;  %v55_v3 = vld [vmem:[#allocation5 + $0x68] sm:$0xff]  ;;  %v54_v4 = vld [vmem:[#allocation5 + $0x60] sm:$0xff]  ;;  %v53_v5 = vld [vmem:[#allocation5 + $0x58] sm:$0xff]  ;;  %s296_s24 = smov [#allocation7]  }
  0x1c   :  { %183 = vmatpush3.msra.mxu0 %v57_v1  ;;  %v52_v6 = vld [vmem:[#allocation5 + $0x50] sm:$0xff]  ;;  %v51_v7 = vld [vmem:[#allocation5 + $0x48] sm:$0xff]  ;;  %v50_v8 = vld [vmem:[#allocation5 + $0x40] sm:$0xff]  ;;  %s154_s25 = sshll.u32 %s296_s24, 4  ;;  %s155_s25 = int_to_ptr.vmem [resolvable:$true] %s154_s25 }
  0x1d   :  { %184 = vmatprep.subr.mxu0 %v294_v0  ;;  %v49_v9 = vld [vmem:[#allocation5 + $0x38] sm:$0xff]  ;;  %v48_v10 = vld [vmem:[#allocation5 + $0x30] sm:$0xff]  ;;  %v47_v11 = vld [vmem:[#allocation5 + $0x28] sm:$0xff]  ;;  %s264_s26 = scalar_lea.vmem %s155_s25, 128  ;;  %p269_p11 = scmp.lt.s32.totalorder %s155_s25, %s155_s25 }
  0x1e   :  { %185 = vmatpush3.msra.mxu0 %v56_v2  ;;  %v46_v12 = vld [vmem:[#allocation5 + $0x20] sm:$0xff]  ;;  %v45_v13 = vld [vmem:[#allocation5 + $0x18] sm:$0xff]  ;;  %v44_v14 = vld [vmem:[#allocation5 + $0x10] sm:$0xff]  ;;  %p265_p10 = scmp.ne.s32.totalorder %s155_s25, %s264_s26  ;;  %p270_p12 = scmp.lt.s32.totalorder %s264_s26, %s264_s26 }
  0x1f   :  { %186 = vmatprep.subr.mxu0 %v294_v0  ;;  %v43_v15 = vld [vmem:[#allocation5 + $0x8] sm:$0xff]  ;;  %v42_v16 = vld [vmem:[#allocation5] sm:$0xff]  ;;  %v41_v17 = vld [vmem:[#allocation2] sm:$0xff] }
  0x20   :  { %187 = vmatpush3.msra.mxu0 %v55_v3  ;;  %v164_v18 = vld [vmem:[%s331_s2] ss:$0 sm:$0xff]  ;;  %p271_p13 = por %p270_p12, %p269_p11 }
  0x21   :  { %188 = vmatprep.subr.mxu0 %v294_v0 }
  0x22   :  { %189 = vmatpush3.msra.mxu0 %v54_v4  ;;  %p272_p0 = pnand %p271_p13, %p265_p10 }
  0x23   :  { %190 = vmatprep.subr.mxu0 %v294_v0 }
  0x24   :  { %191 = vmatpush3.msra.mxu0 %v53_v5 }
  0x25   :  { %192 = vmatprep.subr.mxu0 %v294_v0 }
  0x26   :  { %193 = vmatpush3.msra.mxu0 %v52_v6 }
  0x27   :  { %194 = vmatprep.subr.mxu0 %v294_v0 }
  0x28   :  { %195 = vmatpush3.msra.mxu0 %v51_v7 }
  0x29   :  { %196 = vmatprep.subr.mxu0 %v294_v0 }
  0x2a   :  { %197 = vmatpush3.msra.mxu0 %v50_v8 }
  0x2b   :  { %198 = vmatprep.subr.mxu0 %v294_v0 }
  0x2c   :  { %199 = vmatpush3.msra.mxu0 %v49_v9 }
  0x2d   :  { %200 = vmatprep.subr.mxu0 %v294_v0 }
  0x2e   :  { %201 = vmatpush3.msra.mxu0 %v48_v10 }
  0x2f   :  { %202 = vmatprep.subr.mxu0 %v294_v0 }
  0x30   :  { %203 = vmatpush3.msra.mxu0 %v47_v11 }
  0x31   :  { %204 = vmatprep.subr.mxu0 %v294_v0 }
  0x32   :  { %205 = vmatpush3.msra.mxu0 %v46_v12 }
  0x33   :  { %206 = vmatprep.subr.mxu0 %v294_v0 }
  0x34   :  { %207 = vmatpush3.msra.mxu0 %v45_v13 }
  0x35   :  { %208 = vmatprep.subr.mxu0 %v294_v0 }
  0x36   :  { %209 = vmatpush3.msra.mxu0 %v44_v14 }
  0x37   :  { %210 = vmatprep.subr.mxu0 %v294_v0 }
  0x38   :  { %211 = vmatpush3.msra.mxu0 %v43_v15 }
  0x39   :  { %212 = vmatprep.subr.mxu0 %v294_v0 }
  0x3a   :  { %213 = vmatpush3.msra.mxu0 %v42_v16 }
  0x3b   :  { %215 = vmatmul.mubr.f32.vlgmr.msra.gmra.mxu0 %v41_v17 }
  0xfb   :  { %v124_v19 = vpop.f32.mrf.mxu0 }
  0xfc   :  { %v139_v20 = vadd.f32 %v164_v18, %v124_v19 }
  0xfd   :  { %v216_v21 = vpop.f32.mrf.mxu0 }
  0xfe   :  { %140 = vst [vmem:[#allocation7] sm:$0xff] %v139_v20 }
  0xff   :  { %275 = shalt.err (!%p272_p0)
}
 0x100   :  { %157 = dma.vmem_to_hbm [thread:$0]  %s155_s25, 128, %s332_s3, [#allocation4]  }
 0x101   :  { %288 = dma.done.wait [#allocation4], 128  }
 0x102   :  { %289 = vsyncadd [#allocation4], 4294967168 }
 0x103   :  { %161 = vsyncpa [#allocation3], 1 }
 0x104   :  { %162 = vsyncpa [#allocation6], 1 }
 0x105   :  { %163 = vsyncpa [#allocation4], 1 }

</bundles_post_ra>
